<compile_context>
chip_gen: v5e
topology: v5e:2x2
jax: 0.10.0
libtpu: 0.0.40
codegen_flags: <defaults>
</compile_context>

<pallas_src>
import functools

import jax
import jax.numpy as jnp
from jax.experimental import pallas as pl
from jax.experimental.pallas import tpu as pltpu


# ----------------------------- Pallas kernels --------------------------------
def _make_fused_mlp_kernel(num_layers):
    """Kernel applying `num_layers` linear layers back to back on one M tile.

    Ref order: x_ref, w0, b0, w1, b1, ..., o_ref.
    Intermediates are kept as f32 values (vregs / compiler-managed VMEM) and
    never written back to HBM.
    """

    def kernel(*refs):
        x_ref = refs[0]
        o_ref = refs[1 + 2 * num_layers]
        h = x_ref[...].astype(jnp.float32)
        for l in range(num_layers):
            w_ref = refs[1 + 2 * l]
            b_ref = refs[2 + 2 * l]
            # MXU matmul (bf16 inputs, f32 accumulation); f32 VPU bias add.
            h = (
                jnp.dot(h.astype(w_ref.dtype), w_ref[...],
                        preferred_element_type=jnp.float32)
                + b_ref[...].astype(jnp.float32)
            )
        o_ref[...] = h.astype(o_ref.dtype)

    return kernel


def _resident_spec(shape):
    """Full-array block whose index does NOT depend on the grid position.

    The same VMEM copy is reused across every batch tile (no per-step DMA).
    """
    ndim = len(shape)
    return pl.BlockSpec(shape, lambda i: (0,) * ndim)


@functools.partial(jax.jit, static_argnames=("block_m",))
def fused_mlp(x, weights, biases, *, block_m=256):
    """Apply the whole Linear chain in ONE batch-tiled pallas_call.

    x:       [B, D_in]   (B a multiple of 8 and ideally of block_m;
                          D_in a multiple of 128)
    weights: tuple of [D_l, D_{l+1}] arrays (dims multiples of 128; bf16 ok)
    biases:  tuple of [1, D_{l+1}] arrays (f32)
    """
    num_layers = len(weights)
    B, d_in = x.shape
    d_out = weights[-1].shape[1]

    tm = min(block_m, B)
    grid_m = pl.cdiv(B, tm)

    in_specs = [pl.BlockSpec((tm, d_in), lambda i: (i, 0))]
    args = [x]
    for w, b in zip(weights, biases):
        in_specs.append(_resident_spec(w.shape))
        in_specs.append(_resident_spec(b.shape))
        args.append(w)
        args.append(b)
    out_spec = pl.BlockSpec((tm, d_out), lambda i: (i, 0))

    # Cost estimate for XLA's scheduler.
    flops = sum(2 * B * w.shape[0] * w.shape[1] + B * w.shape[1]
                for w in weights)
    bytes_accessed = (
        x.size * x.dtype.itemsize
        + sum(w.size * w.dtype.itemsize + b.size * b.dtype.itemsize
              for w, b in zip(weights, biases))
        + B * d_out * x.dtype.itemsize
    )

    # Explicit VMEM budget: resident weights/biases + double-buffered x/out
    # tiles + headroom for the f32 intermediate chain.
    resident_bytes = sum(w.size * w.dtype.itemsize + b.size * b.dtype.itemsize
                         for w, b in zip(weights, biases))
    d_max = max([d_in] + [w.shape[1] for w in weights])
    act_bytes = (2 * tm * d_in * x.dtype.itemsize
                 + 2 * tm * d_out * x.dtype.itemsize
                 + (num_layers + 1) * tm * d_max * 4)
    vmem_limit = int(min(64 << 20,
                         max(32 << 20, 2 * (resident_bytes + act_bytes))))

    return pl.pallas_call(
        _make_fused_mlp_kernel(num_layers),
        out_shape=jax.ShapeDtypeStruct((B, d_out), x.dtype),
        grid_spec=pltpu.PrefetchScalarGridSpec(
            num_scalar_prefetch=0,
            grid=(grid_m,),
            in_specs=in_specs,
            out_specs=out_spec,
        ),
        compiler_params=pltpu.CompilerParams(
            dimension_semantics=("parallel",),
            vmem_limit_bytes=vmem_limit,
        ),
        cost_estimate=pl.CostEstimate(
            flops=flops, transcendentals=0, bytes_accessed=bytes_accessed),
    )(*args)


# Conservative resident-weight budget (v7x has 64 MiB physical VMEM; leave
# room for double-buffered activation tiles and compiler scratch).
_WEIGHT_RESIDENCY_BUDGET_BYTES = 24 << 20


def apply_linear_chain(x, weights, biases, *, block_m=256):
    """Apply a chain of linear layers, choosing the residency strategy."""
    weights = tuple(weights)
    biases = tuple(biases)
    resident = sum(w.size * w.dtype.itemsize + b.size * b.dtype.itemsize
                   for w, b in zip(weights, biases))
    if resident <= _WEIGHT_RESIDENCY_BUDGET_BYTES:
        return fused_mlp(x, weights, biases, block_m=block_m)
    # TODO(synk): for chains whose resident weights exceed the VMEM budget, a
    # fully fused variant would stream weights per layer (pl.Buffered /
    # pltpu.emit_pipeline); here we fall back to one batch-tiled kernel per
    # layer so each weight is only resident for its own layer.
    h = x
    for w, b in zip(weights, biases):
        h = fused_mlp(h, (w,), (b,), block_m=block_m)
    return h


def pallas_linear(x, w, b):
    """Single linear layer (used by Linear.forward); same fused machinery."""
    return apply_linear_chain(x, (w,), (b,))


# ------------------------- Module / container glue --------------------------
class Module:
    """Minimal JAX-side analogue of the reference Module base class."""

    def __init__(self):
        self.params = {}
        self.modules = {}
        self.buffers = {}
        self.training = True

    def register_parameter(self, name, value):
        self.params[name] = value

    def register_module(self, name, value):
        self.modules[name] = value

    def parameters(self):
        for p in self.params.values():
            yield p
        for m in self.modules.values():
            yield from m.parameters()

    def named_parameters(self, prefix=""):
        for n, p in self.params.items():
            yield (prefix + n, p)
        for mn, m in self.modules.items():
            yield from m.named_parameters(prefix + mn + ".")

    def train(self):
        self.training = True
        for m in self.modules.values():
            m.train()

    def eval(self):
        self.training = False
        for m in self.modules.values():
            m.eval()

    def __call__(self, *args, **kwargs):
        return self.forward(*args, **kwargs)

    def forward(self, *args, **kwargs):
        raise NotImplementedError


class Linear(Module):
    """Linear layer whose forward pass runs in a Pallas TPU kernel.

    Weights are stored in bf16 (native MXU input path, half the VMEM/HBM
    footprint); bias stays f32 and the matmul accumulates in f32.
    """

    def __init__(self, key, in_features, out_features,
                 weight_dtype=jnp.bfloat16, bias_dtype=jnp.float32):
        super().__init__()
        kw, kb = jax.random.split(key)
        scale = 1.0 / (in_features ** 0.5)
        w = jax.random.uniform(
            kw, (in_features, out_features), jnp.float32,
            minval=-scale, maxval=scale).astype(weight_dtype)
        b = jax.random.uniform(
            kb, (1, out_features), jnp.float32,
            minval=-scale, maxval=scale).astype(bias_dtype)
        self.register_parameter("weight", w)
        self.register_parameter("bias", b)

    def forward(self, x):
        return pallas_linear(x, self.params["weight"], self.params["bias"])


class ModuleList(Module):
    """A module that is just a list of modules (mirrors the reference class)."""

    def __init__(self, modules):
        super().__init__()
        self.module_list = list(modules)
        for i, module in enumerate(self.module_list):
            self.register_module(f"{i}", module)

    def forward(self, *args, **kwargs):
        # Reference implementation is `pass` -> returns None.  Reproduced exactly.
        pass

    def __getitem__(self, i):
        return self.module_list[i]

    def __iter__(self):
        return iter(self.module_list)

    def __len__(self):
        return len(self.module_list)


def apply_modulelist_fused(module_list, x, *, block_m=256):
    """Apply every contained Linear module in order with ONE fused kernel.

    This is the performance-optimal path for the canonical "iterate the
    container and apply each module" usage: weights stay VMEM-resident across
    the whole chain and intermediate activations never touch HBM.
    """
    weights = tuple(layer.params["weight"] for layer in module_list)
    biases = tuple(layer.params["bias"] for layer in module_list)
    return apply_linear_chain(x, weights, biases, block_m=block_m)


# --------------------------------- main --------------------------------------
if __name__ == "__main__":
    key = jax.random.PRNGKey(0)
    k_in, k0, k1, k2 = jax.random.split(key, 4)

    # Lane-dense shapes: feature widths = 128 (full vreg lane width).  Batch
    # of 128 with a 64-row M tile exercises the batch grid (2 grid steps,
    # weights resident across both) while staying small.
    batch, d0, d1, d2 = 128, 128, 128, 128
    block_m = 64
    x = jax.random.normal(k_in, (batch, d0), jnp.float32)

    layers = ModuleList(
        [
            Linear(k0, d0, d1),
            Linear(k1, d1, d1),
            Linear(k2, d1, d2),
        ]
    )
    layers.eval()

    # ModuleList.forward itself is a no-op, exactly like the reference module.
    assert layers(x) is None

    # Optimized usage: fuse the whole chain into one batch-tiled pallas_call.
    y = apply_modulelist_fused(layers, x, block_m=block_m)
    y = jax.block_until_ready(y)

    # Per-layer iteration path still works (each Linear.forward is a Pallas
    # kernel); check it matches the fused result.
    y_iter = x
    for layer in layers:
        y_iter = layer(y_iter)
    y_iter = jax.block_until_ready(y_iter)

    # Reference check in plain JAX with matching precision (bf16 matmul
    # inputs, f32 accumulation, f32 bias add).
    y_ref = x
    for layer in layers:
        w = layer.params["weight"]
        b = layer.params["bias"]
        y_ref = (
            jnp.dot(y_ref.astype(w.dtype), w,
                    preferred_element_type=jnp.float32)
            + b.astype(jnp.float32)
        )

    assert y.shape == (batch, d2)
    assert jnp.allclose(y, y_ref, atol=1e-2, rtol=1e-2)
    assert jnp.allclose(y_iter, y_ref, atol=1e-2, rtol=1e-2)

    # TODO(synk): ModuleList.forward has no compute to translate (it is `pass`
    # in the reference); the Pallas kernel implements the fused application of
    # the contained Linear modules instead.  Parameter autograd bookkeeping
    # (zero_grad / requires_grad) and .to(device) have no Pallas equivalent.
    print("KERNEL_OK")
</pallas_src>

<mosaic_0001>
module attributes {stable_mosaic.version = 11 : i64} {
  func.func @kernel(%arg0: i32, %arg1: memref<64x128xf32, #tpu.memory_space<vmem>>, %arg2: memref<128x128xbf16, #tpu.memory_space<vmem>>, %arg3: memref<1x128xf32, #tpu.memory_space<vmem>>, %arg4: memref<128x128xbf16, #tpu.memory_space<vmem>>, %arg5: memref<1x128xf32, #tpu.memory_space<vmem>>, %arg6: memref<128x128xbf16, #tpu.memory_space<vmem>>, %arg7: memref<1x128xf32, #tpu.memory_space<vmem>>, %arg8: memref<64x128xf32, #tpu.memory_space<vmem>>) attributes {dimension_semantics = [#tpu.dimension_semantics<parallel>], iteration_bounds = array<i64: 2>, scalar_prefetch = 0 : i64, scratch_operands = 0 : i64, tpu.core_type = #tpu.core_type<tc>, window_params = [{transform_indices = @transform_0, window_bounds = array<i64: 64, 128>}, {pipeline_mode = #tpu.pipeline_mode<synchronous>, transform_indices = @transform_1, window_bounds = array<i64: 128, 128>}, {pipeline_mode = #tpu.pipeline_mode<synchronous>, transform_indices = @transform_2, window_bounds = array<i64: 1, 128>}, {pipeline_mode = #tpu.pipeline_mode<synchronous>, transform_indices = @transform_3, window_bounds = array<i64: 128, 128>}, {pipeline_mode = #tpu.pipeline_mode<synchronous>, transform_indices = @transform_4, window_bounds = array<i64: 1, 128>}, {pipeline_mode = #tpu.pipeline_mode<synchronous>, transform_indices = @transform_5, window_bounds = array<i64: 128, 128>}, {pipeline_mode = #tpu.pipeline_mode<synchronous>, transform_indices = @transform_6, window_bounds = array<i64: 1, 128>}, {transform_indices = @transform_7, window_bounds = array<i64: 64, 128>}]} {
    %c0 = arith.constant 0 : index
    %c0_0 = arith.constant 0 : index
    %0 = vector.load %arg1[%c0, %c0_0] : memref<64x128xf32, #tpu.memory_space<vmem>>, vector<64x128xf32>
    %1 = arith.truncf %0 : vector<64x128xf32> to vector<64x128xbf16>
    %c0_1 = arith.constant 0 : index
    %c0_2 = arith.constant 0 : index
    %2 = vector.load %arg2[%c0_1, %c0_2] : memref<128x128xbf16, #tpu.memory_space<vmem>>, vector<128x128xbf16>
    %cst = arith.constant dense<0.000000e+00> : vector<64x128xf32>
    %3 = tpu.matmul %1, %2, %cst {dimension_numbers = #tpu.dot_dimension_numbers<[1], [0], [0], [1], [0, 0, 1, 1], [], []>} : vector<64x128xbf16>, vector<128x128xbf16>, vector<64x128xf32> -> vector<64x128xf32>
    %c0_3 = arith.constant 0 : index
    %c0_4 = arith.constant 0 : index
    %4 = vector.load %arg3[%c0_3, %c0_4] : memref<1x128xf32, #tpu.memory_space<vmem>>, vector<1x128xf32>
    %5 = vector.broadcast %4 : vector<1x128xf32> to vector<64x128xf32>
    %6 = arith.addf %3, %5 : vector<64x128xf32>
    %7 = arith.truncf %6 : vector<64x128xf32> to vector<64x128xbf16>
    %c0_5 = arith.constant 0 : index
    %c0_6 = arith.constant 0 : index
    %8 = vector.load %arg4[%c0_5, %c0_6] : memref<128x128xbf16, #tpu.memory_space<vmem>>, vector<128x128xbf16>
    %cst_7 = arith.constant dense<0.000000e+00> : vector<64x128xf32>
    %9 = tpu.matmul %7, %8, %cst_7 {dimension_numbers = #tpu.dot_dimension_numbers<[1], [0], [0], [1], [0, 0, 1, 1], [], []>} : vector<64x128xbf16>, vector<128x128xbf16>, vector<64x128xf32> -> vector<64x128xf32>
    %c0_8 = arith.constant 0 : index
    %c0_9 = arith.constant 0 : index
    %10 = vector.load %arg5[%c0_8, %c0_9] : memref<1x128xf32, #tpu.memory_space<vmem>>, vector<1x128xf32>
    %11 = vector.broadcast %10 : vector<1x128xf32> to vector<64x128xf32>
    %12 = arith.addf %9, %11 : vector<64x128xf32>
    %13 = arith.truncf %12 : vector<64x128xf32> to vector<64x128xbf16>
    %c0_10 = arith.constant 0 : index
    %c0_11 = arith.constant 0 : index
    %14 = vector.load %arg6[%c0_10, %c0_11] : memref<128x128xbf16, #tpu.memory_space<vmem>>, vector<128x128xbf16>
    %cst_12 = arith.constant dense<0.000000e+00> : vector<64x128xf32>
    %15 = tpu.matmul %13, %14, %cst_12 {dimension_numbers = #tpu.dot_dimension_numbers<[1], [0], [0], [1], [0, 0, 1, 1], [], []>} : vector<64x128xbf16>, vector<128x128xbf16>, vector<64x128xf32> -> vector<64x128xf32>
    %c0_13 = arith.constant 0 : index
    %c0_14 = arith.constant 0 : index
    %16 = vector.load %arg7[%c0_13, %c0_14] : memref<1x128xf32, #tpu.memory_space<vmem>>, vector<1x128xf32>
    %17 = vector.broadcast %16 : vector<1x128xf32> to vector<64x128xf32>
    %18 = arith.addf %15, %17 : vector<64x128xf32>
    %c0_15 = arith.constant 0 : index
    %c0_16 = arith.constant 0 : index
    %19 = vector.load %arg8[%c0_15, %c0_16] : memref<64x128xf32, #tpu.memory_space<vmem>>, vector<64x128xf32>
    tpu.vector_store %arg8[%c0_15, %c0_16], %18 {strides = array<i32>} : memref<64x128xf32, #tpu.memory_space<vmem>>, vector<64x128xf32>,
    return
  }
  func.func @transform_0(%arg0: i32) -> (i32, i32) {
    %c0_i32 = arith.constant 0 : i32
    %c0_i32_0 = arith.constant 0 : i32
    return %arg0, %c0_i32 : i32, i32
  }
  func.func @transform_1(%arg0: i32) -> (i32, i32) {
    %c0_i32 = arith.constant 0 : i32
    %c0_i32_0 = arith.constant 0 : i32
    %c0_i32_1 = arith.constant 0 : i32
    return %c0_i32, %c0_i32_0 : i32, i32
  }
  func.func @transform_2(%arg0: i32) -> (i32, i32) {
    %c0_i32 = arith.constant 0 : i32
    %c0_i32_0 = arith.constant 0 : i32
    %c0_i32_1 = arith.constant 0 : i32
    return %c0_i32, %c0_i32_0 : i32, i32
  }
  func.func @transform_3(%arg0: i32) -> (i32, i32) {
    %c0_i32 = arith.constant 0 : i32
    %c0_i32_0 = arith.constant 0 : i32
    %c0_i32_1 = arith.constant 0 : i32
    return %c0_i32, %c0_i32_0 : i32, i32
  }
  func.func @transform_4(%arg0: i32) -> (i32, i32) {
    %c0_i32 = arith.constant 0 : i32
    %c0_i32_0 = arith.constant 0 : i32
    %c0_i32_1 = arith.constant 0 : i32
    return %c0_i32, %c0_i32_0 : i32, i32
  }
  func.func @transform_5(%arg0: i32) -> (i32, i32) {
    %c0_i32 = arith.constant 0 : i32
    %c0_i32_0 = arith.constant 0 : i32
    %c0_i32_1 = arith.constant 0 : i32
    return %c0_i32, %c0_i32_0 : i32, i32
  }
  func.func @transform_6(%arg0: i32) -> (i32, i32) {
    %c0_i32 = arith.constant 0 : i32
    %c0_i32_0 = arith.constant 0 : i32
    %c0_i32_1 = arith.constant 0 : i32
    return %c0_i32, %c0_i32_0 : i32, i32
  }
  func.func @transform_7(%arg0: i32) -> (i32, i32) {
    %c0_i32 = arith.constant 0 : i32
    %c0_i32_0 = arith.constant 0 : i32
    return %arg0, %c0_i32 : i32, i32
  }
}

</mosaic_0001>

<bundles_post_ra>
// kernel: fused_mlp.1
= control target key start
LH: loop header
LB: loop body
LE: loop exit
PB: predicated region body
PF: predicated region fallthrough
CT: control target
= control target key end

     0   :  { %s1452_s0 = inlined_call_operand.hbm [shape: f32[128,128], index: 0, kind: input, shape index: {}]   ;;  %s1453_s1 = inlined_call_operand.hbm [shape: bf16[128,128], index: 1, kind: input, shape index: {}]   ;;  %s1454_s2 = inlined_call_operand.vmem [shape: f32[1,128], index: 2, kind: input, shape index: {}]   ;;  %s1455_s3 = inlined_call_operand.hbm [shape: bf16[128,128], index: 3, kind: input, shape index: {}]   ;;  %s1456_s4 = inlined_call_operand.vmem [shape: f32[1,128], index: 4, kind: input, shape index: {}]   ;;  %s1457_s5 = inlined_call_operand.hbm [shape: bf16[128,128], index: 5, kind: input, shape index: {}]   ;;  %s1458_s6 = inlined_call_operand.vmem [shape: f32[1,128], index: 6, kind: input, shape index: {}]   ;;  %s1459_s7 = inlined_call_operand.hbm [shape: f32[128,128], index: 7, kind: output, shape index: {}]  }
   0x1   :  { %1460 = sst [smem:[#allocation15_spill]] %s1453_s1 }
   0x2   :  { %12 = vsyncpa [#allocation3], 0 }
   0x3   :  { %14 = vsyncpa [#allocation3 + $0x1], 0 }
   0x4   :  { %15 = vsyncpa [#allocation6], 0 }
   0x5   :  { %16 = vsyncpa [#allocation9], 0 }
   0x6   :  { %17 = vsyncpa [#allocation4], 0 }
   0x7   :  { %19 = vsyncpa [#allocation4 + $0x1], 0  ;;  %s1269_s24 = smov 0   ;;  %s1271_s25 = smov 0  }
   0x8   :  { %s1273_s26 = smov 0   ;;  %s1275_s27 = smov 0  }
   0x9 LB: > { %s1290_s28 = sadd.s32 4294967295, %s1218_s27   ;;  %s788_s29 = sadd.s32 4294967294, %s1218_s27   ;;  %s1218_s27 = sphi %s1275_s27, %s1472_s27   ;;  %s1214_s26 = sphi %s1273_s26, %s1471_s26   ;;  %s1210_s25 = sphi %s1271_s25, %s1470_s25   ;;  %s1206_s24 = sphi %s1269_s24, %s1469_s24  }
   0xa   : > { %p45_p0 = scmp.ne.s32.totalorder %s1210_s25, %s1206_s24  ;;  %p46_p1 = scmp.eq.s32.totalorder %s1290_s28, 0 }
   0xb   : > { %p195_p2 = scmp.eq.s32.totalorder %s1290_s28, 1  ;;  %p201_p3 = scmp.eq.s32.totalorder %s788_s29, 1 }
   0xc   : > { %p1299_p4 = por %p46_p1, %p45_p0  ;;  %p789_p5 = scmp.ge.s32.totalorder %s1218_s27, 1 }
   0xd   : > { %p1304_p6 = por %p201_p3, %p45_p0  ;;  %p208_p7 = scmp.lt.s32.totalorder %s1218_s27, 3 }
   0xe   : > { %s1463_s1 = sld [smem:[#allocation15_spill]]  ;;  %s1220_s13 = smov [#allocation5]  }
   0xf   : > { %p1312_p8 = pnand %p789_p5, %p208_p7  ;;  %s221_s14 = sshll.u32 %s1220_s13, 4  ;;  %s222_s14 = int_to_ptr.vmem [resolvable:$true] %s221_s14 }
  0x10   : > { %s236_s18 = sshll.u32 %s1455_s3, 4  ;;  %s1221_s19 = smov 64   ;;  %s237_s18 = int_to_ptr.hbm [resolvable:$true] %s236_s18 }
  0x11   : > { %p954_p9 = pneg %p1312_p8  ;;  %s1222_s20 = smov 4  }
  0x12   : > { %s1223_s21 = smov [#allocation7]   ;;  %s253_s9 = sshll.u32 %s1457_s5, 4  ;;  %s254_s9 = int_to_ptr.hbm [resolvable:$true] %s253_s9 }
  0x13   : > { %p1320_p10 = pnand %p954_p9, %p46_p1  ;;  %s238_s22 = sshll.u32 %s1223_s21, 4  ;;  %s239_s22 = int_to_ptr.vmem [resolvable:$true] %s238_s22 }
  0x14   : > { %s219_s11 = sshll.u32 %s1463_s1, 4  ;;  %s1224_s10 = smov [#allocation8]   ;;  %s220_s11 = int_to_ptr.hbm [resolvable:$true] %s219_s11 }
  0x15   : > { %957 = dma.hbm_to_vmem [thread:$0]  (!%p1320_p10), %s220_s11, 1024, %s222_s14, [#allocation6], %s1221_s19, %s1221_s19, %s1222_s20  }
  0x16   : > { %960 = dma.hbm_to_vmem [thread:$0]  (!%p1320_p10), %s237_s18, 1024, %s239_s22, [#allocation6], %s1221_s19, %s1221_s19, %s1222_s20  }
  0x17   : > { %s255_s13 = sshll.u32 %s1224_s10, 4  ;;  %s1336_s11 = sadd.s32 1, %s1218_s27   ;;  %s256_s13 = int_to_ptr.vmem [resolvable:$true] %s255_s13 }
  0x18   : > { %963 = dma.hbm_to_vmem [thread:$0]  (!%p1320_p10), %s254_s9, 1024, %s256_s13, [#allocation9], %s1221_s19, %s1221_s19, %s1222_s20  }
  0x19   : > { %s29_s14 = ssub.s32 %s1218_s27, %s1336_s11  ;;  %s32_s16 = sadd.s32 1, %s1214_s26 }
  0x1a   : > { %p30_p12 = scmp.eq.s32.totalorder %s29_s14, 0  ;;  %p39_p13 = scmp.ne.s32.totalorder %s1214_s26, %s1210_s25 }
  0x1b   : > { %p40_p0 = scmp.eq.s32.totalorder %s1218_s27, 0  ;;  %p975_p3 = scmp.lt.s32.totalorder %s1218_s27, 2 }
  0x1c   : > { %s1348_s17 = scalar_select %p30_p12, %s1214_s26, %s32_s16  }
  0x1d   : > { %p41_p5 = por %p40_p0, %p39_p13  ;;  %p1352_p7 = por %p195_p2, %p39_p13 }
  0x1e   : > { %s272_s21 = sand.u32 1, %s1214_s26   ;;  %s904_s22 = sshll.u32 %s1218_s27, 6 }
  0x1f   : > { %s794_s15 = sshll.u32 %s272_s21, 6  ;;  %s281_s20 = scalar_lea.hbm %s1452_s0, %s904_s22 }
  0x20   : > { %s282_s29 = sshll.u32 %s281_s20, 4  ;;  %s276_s9 = scalar_lea.vmem [#allocation2], %s794_s15  ;;  %s283_s29 = int_to_ptr.hbm [resolvable:$true] %s282_s29 }
  0x21   : > { %s284_s10 = sshll.u32 %s276_s9, 4  ;;  %p1363_p9 = pnand %p975_p3, %p41_p5  ;;  %s285_s10 = int_to_ptr.vmem [resolvable:$true] %s284_s10 }
  0x22   : > { %s273_s14 = scalar_lea.sflag [#allocation3], %s272_s21  ;;  %s1114_s16 = sshra.s32 %s283_s29, 4  ;;  %s1115_s16 = int_to_ptr.hbm [resolvable:$true] %s1114_s16 }
  0x23   : > { %s1116_s1 = scalar_lea.hbm %s1115_s16, 64  ;;  %p1118_p10 = pneg %p1363_p9 }
  0x24   : > { %p1117_p2 = scmp.ne.s32.totalorder %s1115_s16, %s1116_s1  ;;  %s1121_s23 = scalar_lea.hbm %s1452_s0, 128 }
  0x25   : > { %p1122_p0 = scmp.lt.s32.totalorder %s1115_s16, %s1452_s0  ;;  %p1123_p3 = scmp.lt.s32.totalorder %s1121_s23, %s1116_s1 }
  0x26   : > { %p1119_p12 = pnand %p1118_p10, %p1117_p2 }
  0x27   : > { %p1124_p5 = por %p1123_p3, %p1122_p0 }
  0x28   : > { %p1120_p13 = pneg %p1119_p12 }
  0x2a   : > { %p1125_p11 = pnand %p1124_p5, %p1120_p13 }
  0x2c   : > { %1128 = shalt.err (!%p1125_p11)
}
  0x2d   : > { %s1225_s21 = smov 128   ;;  %s1226_s9 = smov 8  }
  0x2e   : > { %967 = dma.hbm_to_vmem [thread:$0]  (!%p1363_p9), %s283_s29, 1024, %s285_s10, %s273_s14, %s1225_s21, %s1225_s21, %s1226_s9  }
  0x2f   : > { %296 = sbr.rel (%p1312_p8) target bundleno = 559 (0x22f), region = 48  ;;  %s1380_s22 = sand.u32 (!%p1312_p8), 1, %s1210_s25  }
  0x30   : > { %s798_s16 = sshll.u32 (!%p1312_p8), %s1380_s22, 6  ;;  %s299_s1 = scalar_lea.sflag (!%p1312_p8), [#allocation3], %s1380_s22 }
  0x31   : > { %s1386_s15 = scalar_lea.vmem (!%p1312_p8), [#allocation2], %s798_s16 }
  0x34   : > { %1189 = dma.done.wait (%p1299_p4), %s299_s1, 1024  }
  0x35   : > { %1191 = vsyncadd (%p1299_p4), %s299_s1, 4294966272 }
  0x36   : > { %1193 = dma.done.wait (%p46_p1), [#allocation6], 2048  }
  0x37   : > { %1195 = vsyncadd (%p46_p1), [#allocation6], 4294965248 }
  0x38   : > { %1197 = dma.done.wait (%p46_p1), [#allocation9], 1024  }
  0x39   : > { %1199 = vsyncadd (%p46_p1), [#allocation9], 4294966272  ;;  %v912_v0 = vld [vmem:[#allocation5 + $0x38] sm:$0xff]  ;;  %v911_v1 = vld [vmem:[#allocation5 + $0x30] sm:$0xff]  ;;  %s348_s23 = scalar_lea.vmem [#allocation10], %s798_s16  ;;  %s929_s19 = sshll.u32 %s1290_s28, 6 }
  0x3a   : > { %431 = vmatpush.bf16.msra.mxu0 %v912_v0  ;;  %930 = vmatpush.bf16.msra.mxu3 %v912_v0  ;;  %v910_v2 = vld [vmem:[#allocation5 + $0x28] sm:$0xff]  ;;  %v909_v3 = vld [vmem:[#allocation5 + $0x20] sm:$0xff]  ;;  %v908_v4 = vld [vmem:[#allocation5 + $0x18] sm:$0xff]  ;;  %s682_s9 = scalar_lea.hbm %s1459_s7, %s929_s19  ;;  %s683_s16 = sshll.u32 %s348_s23, 4  ;;  %s684_s16 = int_to_ptr.vmem [resolvable:$true] %s683_s16 }
  0x3b   : > { %v907_v5 = vld [vmem:[#allocation5 + $0x10] sm:$0xff]  ;;  %v906_v6 = vld [vmem:[#allocation5 + $0x8] sm:$0xff]  ;;  %v905_v7 = vld [vmem:[#allocation5] sm:$0xff]  ;;  %s685_s1 = sshll.u32 %s682_s9, 4  ;;  %s1164_s10 = scalar_lea.hbm %s1459_s7, 128  ;;  %s686_s1 = int_to_ptr.hbm [resolvable:$true] %s685_s1 }
  0x3c   : > { %v351_v8 = vld [vmem:[%s1386_s15] sm:$0xff]  ;;  %v352_v9 = vld [vmem:[%s1386_s15 + $0x8] sm:$0xff]  ;;  %v353_v10 = vld [vmem:[%s1386_s15 + $0x10] sm:$0xff]  ;;  %s1158_s30 = sshra.s32 %s686_s1, 4  ;;  %s1159_s30 = int_to_ptr.hbm [resolvable:$true] %s1158_s30 }
  0x3d   : > { %v354_v11 = vld [vmem:[%s1386_s15 + $0x18] sm:$0xff]  ;;  %v359_v12 = vpack.c.bf16 %v352_v9, %v351_v8  ;;  %v919_v15 = vld [vmem:[#allocation7 + $0x30] sm:$0xff]  ;;  %v918_v16 = vld [vmem:[#allocation7 + $0x28] sm:$0xff]  ;;  %s1160_s12 = scalar_lea.hbm %s1159_s30, 64  ;;  %p1165_p11 = scmp.lt.s32.totalorder %s1159_s30, %s1459_s7 }
  0x3e   : > { %432 = vmatpush.bf16.msra.mxu0 %v911_v1  ;;  %931 = vmatpush.bf16.msra.mxu3 %v911_v1  ;;  %v360_v13 = vpack.c.bf16 %v354_v11, %v353_v10  ;;  %v920_v14 = vld [vmem:[#allocation7 + $0x38] sm:$0xff]  ;;  %v355_v17 = vld [vmem:[%s1386_s15 + $0x20] sm:$0xff]  ;;  %v356_v18 = vld [vmem:[%s1386_s15 + $0x28] sm:$0xff]  ;;  %p1161_p1 = scmp.ne.s32.totalorder %s1159_s30, %s1160_s12  ;;  %p1166_p9 = scmp.lt.s32.totalorder %s1164_s10, %s1160_s12 }
  0x3f   : > { %532 = vmatpush.bf16.msra.mxu1 %v920_v14  ;;  %v917_v19 = vld [vmem:[#allocation7 + $0x20] sm:$0xff]  ;;  %v361_v20 = vpack.c.bf16 %v356_v18, %v355_v17  ;;  %v916_v21 = vld [vmem:[#allocation7 + $0x18] sm:$0xff]  ;;  %v357_v22 = vld [vmem:[%s1386_s15 + $0x30] sm:$0xff] }
  0x40   : > { %v358_v23 = vld [vmem:[%s1386_s15 + $0x38] sm:$0xff]  ;;  %v915_v25 = vld [vmem:[#allocation7 + $0x10] sm:$0xff]  ;;  %v914_v26 = vld [vmem:[#allocation7 + $0x8] sm:$0xff]  ;;  %s671_s15 = scalar_lea.sflag [#allocation4], %s1380_s22  ;;  %p1162_p4 = pnand %p1161_p1, %p1352_p7 }
  0x41   : > { %v362_v24 = vpack.c.bf16 %v358_v23, %v357_v22  ;;  %v913_v27 = vld [vmem:[#allocation7] sm:$0xff]  ;;  %v928_v40 = vld [vmem:[#allocation8 + $0x38] sm:$0xff]  ;;  %v927_v41 = vld [vmem:[#allocation8 + $0x30] sm:$0xff]  ;;  %p1167_p2 = por %p1166_p9, %p1165_p11 }
  0x42   : > { %433 = vmatpush.bf16.msra.mxu0 %v910_v2  ;;  %932 = vmatpush.bf16.msra.mxu3 %v910_v2  ;;  %v1021_v29 = vld [vmem:[%s1454_s2] ss:$0 sm:$0xff]  ;;  %v926_v43 = vld [vmem:[#allocation8 + $0x28] sm:$0xff]  ;;  %v924_v49 = vld [vmem:[#allocation8 + $0x18] sm:$0xff]  ;;  %p1163_p8 = pneg %p1162_p4 }
  0x43   : > { %533 = vmatpush.bf16.msra.mxu1 %v919_v15  ;;  %633 = vmatpush.bf16.msra.mxu2 %v928_v40  ;;  %v925_v46 = vld [vmem:[#allocation8 + $0x20] sm:$0xff]  ;;  %v923_v54 = vld [vmem:[#allocation8 + $0x10] sm:$0xff]  ;;  %v922_v55 = vld [vmem:[#allocation8 + $0x8] sm:$0xff] }
  0x44   : > { %v921_v56 = vld [vmem:[#allocation8] sm:$0xff]  ;;  %p1168_p10 = pnand %p1167_p2, %p1163_p8 }
  0x45   : > { %v1022_v58 = vld [vmem:[%s1456_s4] ss:$0 sm:$0xff] }
  0x46   : > { %434 = vmatpush.bf16.msra.mxu0 %v909_v3  ;;  %933 = vmatpush.bf16.msra.mxu3 %v909_v3  ;;  %v1023_v14 = vld [vmem:[%s1458_s6] ss:$0 sm:$0xff] }
  0x47   : > { %534 = vmatpush.bf16.msra.mxu1 %v918_v16  ;;  %634 = vmatpush.bf16.msra.mxu2 %v927_v41 }
  0x4a   : > { %435 = vmatpush.bf16.msra.mxu0 %v908_v4  ;;  %934 = vmatpush.bf16.msra.mxu3 %v908_v4 }
  0x4b   : > { %535 = vmatpush.bf16.msra.mxu1 %v917_v19  ;;  %635 = vmatpush.bf16.msra.mxu2 %v926_v43 }
  0x4e   : > { %436 = vmatpush.bf16.msra.mxu0 %v907_v5  ;;  %935 = vmatpush.bf16.msra.mxu3 %v907_v5 }
  0x4f   : > { %536 = vmatpush.bf16.msra.mxu1 %v916_v21  ;;  %636 = vmatpush.bf16.msra.mxu2 %v925_v46 }
  0x52   : > { %437 = vmatpush.bf16.msra.mxu0 %v906_v6  ;;  %936 = vmatpush.bf16.msra.mxu3 %v906_v6 }
  0x53   : > { %537 = vmatpush.bf16.msra.mxu1 %v915_v25  ;;  %637 = vmatpush.bf16.msra.mxu2 %v924_v49 }
  0x56   : > { %438 = vmatpush.bf16.msra.mxu0 %v905_v7  ;;  %937 = vmatpush.bf16.msra.mxu3 %v905_v7 }
  0x57   : > { %538 = vmatpush.bf16.msra.mxu1 %v914_v26  ;;  %638 = vmatpush.bf16.msra.mxu2 %v923_v54 }
  0x59   : > { %439 = vmatmul.bf16.vlgmr.msra.gmra.mxu0 %v359_v12  ;;  %444 = vmatmul.bf16.vlgmr.msra.gmra.mxu3 %v360_v13 }
  0x5b   : > { %539 = vmatpush.bf16.msra.mxu1 %v913_v27  ;;  %639 = vmatpush.bf16.msra.mxu2 %v922_v55 }
  0x5f   : > { %640 = vmatpush.bf16.msra.mxu2 %v921_v56 }
  0x69   : > { %449 = vmatmul.bf16.gmra.mxu3 %v361_v20 }
  0x79   : > { %454 = vmatmul.bf16.gmra.mxu3 %v362_v24 }
  0xd6   : > { %v440_v28 = vpop.f32.mrf.mxu0 }
  0xd7   : > { %v441_v32 = vadd.f32 %v1021_v29, %v440_v28 }
  0xdc   : > { %v445_v30 = vpop.f32.mrf.mxu3 }
  0xdd   : > { %v446_v37 = vadd.f32 %v1021_v29, %v445_v30 }
  0xde   : > { %v442_v31 = vpop.f32.mrf.mxu0 }
  0xdf   : > { %v443_v33 = vadd.f32 %v1021_v29, %v442_v31 }
  0xe1   : > { %v460_v34 = vpack.c.bf16 %v443_v33, %v441_v32 }
  0xe3   : > { %540 = vmatmul.bf16.vlgmr.msra.gmra.mxu1 %v460_v34 }
  0xe4   : > { %v447_v35 = vpop.f32.mrf.mxu3 }
  0xe5   : > { %v448_v38 = vadd.f32 %v1021_v29, %v447_v35 }
  0xe7   : > { %v461_v39 = vpack.c.bf16 %v448_v38, %v446_v37 }
  0xec   : > { %v450_v36 = vpop.f32.mrf.mxu3 }
  0xed   : > { %v451_v44 = vadd.f32 %v1021_v29, %v450_v36 }
  0xf3   : > { %545 = vmatmul.bf16.gmra.mxu1 %v461_v39 }
  0xf4   : > { %v452_v42 = vpop.f32.mrf.mxu3 }
  0xf5   : > { %v453_v45 = vadd.f32 %v1021_v29, %v452_v42 }
  0xf7   : > { %v462_v48 = vpack.c.bf16 %v453_v45, %v451_v44 }
  0xfc   : > { %v455_v47 = vpop.f32.mrf.mxu3 }
  0xfd   : > { %v456_v51 = vadd.f32 %v1021_v29, %v455_v47 }
 0x103   : > { %550 = vmatmul.bf16.gmra.mxu1 %v462_v48 }
 0x104   : > { %v457_v50 = vpop.f32.mrf.mxu3 }
 0x105   : > { %v458_v52 = vadd.f32 %v1021_v29, %v457_v50 }
 0x107   : > { %v463_v53 = vpack.c.bf16 %v458_v52, %v456_v51 }
 0x113   : > { %555 = vmatmul.bf16.gmra.mxu1 %v463_v53 }
 0x160   : > { %v541_v57 = vpop.f32.mrf.mxu1 }
 0x161   : > { %v542_v60 = vadd.f32 %v1022_v58, %v541_v57 }
 0x168   : > { %v543_v59 = vpop.f32.mrf.mxu1 }
 0x169   : > { %v544_v61 = vadd.f32 %v1022_v58, %v543_v59 }
 0x16b   : > { %v561_v62 = vpack.c.bf16 %v544_v61, %v542_v60 }
 0x16d   : > { %641 = vmatmul.bf16.vlgmr.msra.gmra.mxu2 %v561_v62 }
 0x170   : > { %v546_v63 = vpop.f32.mrf.mxu1 }
 0x171   : > { %v547_v1 = vadd.f32 %v1022_v58, %v546_v63 }
 0x178   : > { %v548_v0 = vpop.f32.mrf.mxu1 }
 0x179   : > { %v549_v2 = vadd.f32 %v1022_v58, %v548_v0 }
 0x17b   : > { %v562_v3 = vpack.c.bf16 %v549_v2, %v547_v1 }
 0x17d   : > { %646 = vmatmul.bf16.gmra.mxu2 %v562_v3 }
 0x180   : > { %v551_v4 = vpop.f32.mrf.mxu1 }
 0x181   : > { %v552_v6 = vadd.f32 %v1022_v58, %v551_v4 }
 0x188   : > { %v553_v5 = vpop.f32.mrf.mxu1 }
 0x189   : > { %v554_v7 = vadd.f32 %v1022_v58, %v553_v5 }
 0x18b   : > { %v563_v8 = vpack.c.bf16 %v554_v7, %v552_v6 }
 0x18d   : > { %651 = vmatmul.bf16.gmra.mxu2 %v563_v8 }
 0x190   : > { %v556_v9 = vpop.f32.mrf.mxu1 }
 0x191   : > { %v557_v11 = vadd.f32 %v1022_v58, %v556_v9 }
 0x198   : > { %v558_v10 = vpop.f32.mrf.mxu1 }
 0x199   : > { %v559_v12 = vadd.f32 %v1022_v58, %v558_v10 }
 0x19b   : > { %v564_v13 = vpack.c.bf16 %v559_v12, %v557_v11 }
 0x19d   : > { %656 = vmatmul.bf16.gmra.mxu2 %v564_v13 }
 0x1f0   : > { %v642_v15 = vpop.f32.mrf.mxu2 }
 0x1f1   : > { %v643_v16 = vadd.f32 %v1023_v14, %v642_v15 }
 0x1f3   : > { %662 = vst [vmem:[%s348_s23] sm:$0xff] %v643_v16 }
 0x1f8   : > { %v644_v17 = vpop.f32.mrf.mxu2 }
 0x1f9   : > { %v645_v18 = vadd.f32 %v1023_v14, %v644_v17 }
 0x1fb   : > { %663 = vst [vmem:[%s348_s23 + $0x8] sm:$0xff] %v645_v18 }
 0x200   : > { %v647_v19 = vpop.f32.mrf.mxu2 }
 0x201   : > { %v648_v20 = vadd.f32 %v1023_v14, %v647_v19 }
 0x203   : > { %664 = vst [vmem:[%s348_s23 + $0x10] sm:$0xff] %v648_v20 }
 0x208   : > { %v649_v21 = vpop.f32.mrf.mxu2 }
 0x209   : > { %v650_v22 = vadd.f32 %v1023_v14, %v649_v21 }
 0x20b   : > { %665 = vst [vmem:[%s348_s23 + $0x18] sm:$0xff] %v650_v22 }
 0x210   : > { %v652_v23 = vpop.f32.mrf.mxu2 }
 0x211   : > { %v653_v24 = vadd.f32 %v1023_v14, %v652_v23 }
 0x213   : > { %666 = vst [vmem:[%s348_s23 + $0x20] sm:$0xff] %v653_v24 }
 0x218   : > { %v654_v25 = vpop.f32.mrf.mxu2 }
 0x219   : > { %v655_v26 = vadd.f32 %v1023_v14, %v654_v25 }
 0x21b   : > { %667 = vst [vmem:[%s348_s23 + $0x28] sm:$0xff] %v655_v26 }
 0x220   : > { %v657_v27 = vpop.f32.mrf.mxu2 }
 0x221   : > { %v658_v28 = vadd.f32 %v1023_v14, %v657_v27 }
 0x223   : > { %668 = vst [vmem:[%s348_s23 + $0x30] sm:$0xff] %v658_v28 }
 0x228   : > { %v659_v29 = vpop.f32.mrf.mxu2 }
 0x229   : > { %v660_v30 = vadd.f32 %v1023_v14, %v659_v29 }
 0x22b   : > { %669 = vst [vmem:[%s348_s23 + $0x38] sm:$0xff] %v660_v30 }
 0x22c   : > { %1171 = shalt.err (!%p1168_p10)
}
 0x22d   : > { %s1227_s22 = smov 128   ;;  %s1228_s23 = smov 8  }
 0x22e   : > { %952 = dma.vmem_to_hbm [thread:$0]  (%p1352_p7), %s684_s16, 1024, %s686_s1, %s671_s15, %s1227_s22, %s1227_s22, %s1228_s23  }
 0x22f PF: > { %s700_s19 = sand.u32 1, %s1206_s24   ;;  %p1468_p12 = scmp.ge.s32.totalorder %s1218_s27, 2 }
 0x230   : > { %s701_s20 = scalar_lea.sflag [#allocation4], %s700_s19 }
 0x231   : > { %p969_p13 = pnand %p1468_p12, %p1304_p6 }
 0x233   : > { %p970_p0 = pneg %p969_p13 }
 0x235   : > { %1201 = dma.done.wait (%p970_p0), %s701_s20, 1024  }
 0x236   : > { %1203 = vsyncadd (%p970_p0), %s701_s20, 4294966272  ;;  %p22_p3 = scmp.ge.s32.totalorder %s1336_s11, 4   ;;  %s1469_s24 = smov %s1210_s25 }
 0x237   : > { %s1470_s25 = smov %s1214_s26  ;;  %s1471_s26 = smov %s1348_s17 }
 0x238   : > { %s1472_s27 = smov %s1336_s11  ;;  %24 = sbr.rel (!%p22_p3) target bundleno = 9 (0x9), region = 105 }
 0x23d   :  { %707 = vsyncpa [#allocation3], 1 }
 0x23e   :  { %709 = vsyncpa [#allocation3 + $0x1], 1 }
 0x23f   :  { %710 = vsyncpa [#allocation6], 1 }
 0x240   :  { %711 = vsyncpa [#allocation9], 1 }
 0x241   :  { %712 = vsyncpa [#allocation4], 1 }
 0x242   :  { %714 = vsyncpa [#allocation4 + $0x1], 1 }

</bundles_post_ra>
